<compile_context>
chip_gen: v6e
topology: v6e:2x2x1
jax: 0.10.0
libtpu: 0.0.40
codegen_flags: <defaults>
</compile_context>

<pallas_src>
import functools

import jax
import jax.numpy as jnp
from jax.experimental import pallas as pl
from jax.experimental.pallas import tpu as pltpu

_LANE = 128
_SUBLANE = 8


def _round_up(x, m):
    return (x + m - 1) // m * m


def _fused_mlp_kernel(x_ref, *refs, num_layers: int, has_bias: bool):
    """Whole MLP in one kernel: h = x; per layer h = h @ Wt (+ b); relu except last."""
    o_ref = refs[-1]
    param_refs = refs[:-1]
    h = x_ref[...].astype(jnp.float32)
    for i in range(num_layers):
        if has_bias:
            w_ref, b_ref = param_refs[2 * i], param_refs[2 * i + 1]
        else:
            w_ref, b_ref = param_refs[i], None
        # NOTE: on v6e/v7x, casting h/w to bf16 here (keeping the f32 accumulator)
        # would roughly 4x MXU throughput at production sizes; kept f32 for exact
        # parity with the PyTorch float32 module.
        h = jnp.dot(h, w_ref[...], preferred_element_type=jnp.float32)
        if b_ref is not None:
            h = h + b_ref[...].astype(jnp.float32)
        if i < num_layers - 1:
            h = jnp.maximum(h, 0.0)  # relu
    o_ref[...] = h.astype(o_ref.dtype)


def init_mlp_params(key, sizes, add_bias=False, dtype=jnp.float32):
    """Deterministic init matching nn.Linear layout: weight [out, in], bias [out]."""
    params = []
    for i in range(len(sizes) - 1):
        in_size, out_size = sizes[i], sizes[i + 1]
        key, wk, bk = jax.random.split(key, 3)
        bound = 1.0 / jnp.sqrt(in_size)
        w = jax.random.uniform(wk, (out_size, in_size), dtype, -bound, bound)
        b = (
            jax.random.uniform(bk, (out_size,), dtype, -bound, bound)
            if add_bias
            else None
        )
        params.append((w, b))
    return params


def prepare_kernel_params(params):
    """One-time prep (outside the forward hot path): transpose PyTorch [out, in]
    weights to [in, out] and zero-pad every output (lane) dim up to a multiple
    of 128. Padded columns stay exactly zero through bias+relu, so the math is
    unchanged; the wrapper slices the final output back to the true width."""
    prepped = []
    prev_out_pad = None
    for i, (w, b) in enumerate(params):
        out_f, in_f = w.shape
        in_pad = in_f if i == 0 else prev_out_pad  # layer 0 keeps the true K
        out_pad = _round_up(out_f, _LANE)
        wt = jnp.zeros((in_pad, out_pad), w.dtype).at[:in_f, :out_f].set(w.T)
        bp = (
            jnp.zeros((1, out_pad), b.dtype).at[0, :out_f].set(b)
            if b is not None
            else None
        )
        prepped.append((wt, bp))
        prev_out_pad = out_pad
    return prepped


def mlp_forward(prepped_params, x, *, out_features):
    """Fused MLP forward via a single pallas_call.

    prepped_params: list of (Wt [K_pad, N_pad], bias [1, N_pad] or None)
    x:              [M, K] activations (K = sizes[0])
    returns         [M, out_features]
    """
    M, K = x.shape
    num_layers = len(prepped_params)
    has_bias = prepped_params[0][1] is not None
    n_out_pad = prepped_params[-1][0].shape[1]

    # Batch tiling: rows padded to a multiple of 8; one grid axis over batch
    # tiles ("parallel" -> both TensorCores on v7x when the batch is large).
    if M <= 128:
        tm = _round_up(max(M, 1), _SUBLANE)
    else:
        tm = 128
    m_pad = _round_up(M, tm)
    if m_pad != M:
        x = jnp.pad(x, ((0, m_pad - M), (0, 0)))
    grid = (m_pad // tm,)

    in_specs = [pl.BlockSpec((tm, K), lambda i: (i, 0))]
    args = [x]
    for wt, bp in prepped_params:
        in_specs.append(pl.BlockSpec(wt.shape, lambda i: (0, 0)))
        args.append(wt)
        if has_bias:
            in_specs.append(pl.BlockSpec(bp.shape, lambda i: (0, 0)))
            args.append(bp)

    kernel = functools.partial(
        _fused_mlp_kernel, num_layers=num_layers, has_bias=has_bias
    )
    out = pl.pallas_call(
        kernel,
        out_shape=jax.ShapeDtypeStruct((m_pad, n_out_pad), x.dtype),
        grid_spec=pltpu.PrefetchScalarGridSpec(
            num_scalar_prefetch=0,
            grid=grid,
            in_specs=in_specs,
            out_specs=pl.BlockSpec((tm, n_out_pad), lambda i: (i, 0)),
        ),
        compiler_params=pltpu.CompilerParams(
            dimension_semantics=("parallel",),
        ),
    )(*args)
    return out[:M, :out_features]


def mlp_reference(params, x):
    """Pure-JAX reference matching the PyTorch MLP semantics exactly."""
    n = len(params)
    for i, (w, b) in enumerate(params):
        x = x @ w.T
        if b is not None:
            x = x + b
        if i < n - 1:
            x = jnp.maximum(x, 0.0)
    return x


if __name__ == "__main__":
    key = jax.random.PRNGKey(0)
    sizes = [32, 64, 48, 16]  # MLP("clf", sizes, act_fn="relu", add_bias=False)
    batch = 8

    pkey, xkey = jax.random.split(key)
    params = init_mlp_params(pkey, sizes, add_bias=False)
    x = jax.random.normal(xkey, (batch, sizes[0]), dtype=jnp.float32)

    # One-time weight prep (transpose + lane-dense padding) — not per forward.
    prepped = prepare_kernel_params(params)
    fwd = jax.jit(functools.partial(mlp_forward, out_features=sizes[-1]))

    out = fwd(prepped, x)
    out = jax.block_until_ready(out)

    ref = mlp_reference(params, x)
    assert out.shape == (batch, sizes[-1])
    assert jnp.allclose(out, ref, atol=1e-4, rtol=1e-4), "mismatch vs reference"

    print("KERNEL_OK")
</pallas_src>

<mosaic_0001>
module attributes {stable_mosaic.version = 11 : i64} {
  func.func @_fused_mlp_kernel(%arg0: i32, %arg1: memref<8x32xf32, #tpu.memory_space<vmem>>, %arg2: memref<32x128xf32, #tpu.memory_space<vmem>>, %arg3: memref<128x128xf32, #tpu.memory_space<vmem>>, %arg4: memref<128x128xf32, #tpu.memory_space<vmem>>, %arg5: memref<8x128xf32, #tpu.memory_space<vmem>>) attributes {dimension_semantics = [#tpu.dimension_semantics<parallel>], iteration_bounds = array<i64: 1>, scalar_prefetch = 0 : i64, scratch_operands = 0 : i64, tpu.core_type = #tpu.core_type<tc>, window_params = [{transform_indices = @transform_0, window_bounds = array<i64: 8, 32>}, {pipeline_mode = #tpu.pipeline_mode<synchronous>, transform_indices = @transform_1, window_bounds = array<i64: 32, 128>}, {pipeline_mode = #tpu.pipeline_mode<synchronous>, transform_indices = @transform_2, window_bounds = array<i64: 128, 128>}, {pipeline_mode = #tpu.pipeline_mode<synchronous>, transform_indices = @transform_3, window_bounds = array<i64: 128, 128>}, {transform_indices = @transform_4, window_bounds = array<i64: 8, 128>}]} {
    %c0 = arith.constant 0 : index
    %c0_0 = arith.constant 0 : index
    %0 = vector.load %arg1[%c0, %c0_0] : memref<8x32xf32, #tpu.memory_space<vmem>>, vector<8x32xf32>
    %c0_1 = arith.constant 0 : index
    %c0_2 = arith.constant 0 : index
    %1 = vector.load %arg2[%c0_1, %c0_2] : memref<32x128xf32, #tpu.memory_space<vmem>>, vector<32x128xf32>
    %cst = arith.constant dense<0.000000e+00> : vector<8x128xf32>
    %2 = tpu.matmul %0, %1, %cst {dimension_numbers = #tpu.dot_dimension_numbers<[1], [0], [0], [1], [0, 0, 1, 1], [], []>} : vector<8x32xf32>, vector<32x128xf32>, vector<8x128xf32> -> vector<8x128xf32>
    %cst_3 = arith.constant 0.000000e+00 : f32
    %3 = vector.broadcast %cst_3 : f32 to vector<8x128xf32>
    %4 = arith.maximumf %2, %3 : vector<8x128xf32>
    %c0_4 = arith.constant 0 : index
    %c0_5 = arith.constant 0 : index
    %5 = vector.load %arg3[%c0_4, %c0_5] : memref<128x128xf32, #tpu.memory_space<vmem>>, vector<128x128xf32>
    %cst_6 = arith.constant dense<0.000000e+00> : vector<8x128xf32>
    %6 = tpu.matmul %4, %5, %cst_6 {dimension_numbers = #tpu.dot_dimension_numbers<[1], [0], [0], [1], [0, 0, 1, 1], [], []>} : vector<8x128xf32>, vector<128x128xf32>, vector<8x128xf32> -> vector<8x128xf32>
    %cst_7 = arith.constant 0.000000e+00 : f32
    %7 = vector.broadcast %cst_7 : f32 to vector<8x128xf32>
    %8 = arith.maximumf %6, %7 : vector<8x128xf32>
    %c0_8 = arith.constant 0 : index
    %c0_9 = arith.constant 0 : index
    %9 = vector.load %arg4[%c0_8, %c0_9] : memref<128x128xf32, #tpu.memory_space<vmem>>, vector<128x128xf32>
    %cst_10 = arith.constant dense<0.000000e+00> : vector<8x128xf32>
    %10 = tpu.matmul %8, %9, %cst_10 {dimension_numbers = #tpu.dot_dimension_numbers<[1], [0], [0], [1], [0, 0, 1, 1], [], []>} : vector<8x128xf32>, vector<128x128xf32>, vector<8x128xf32> -> vector<8x128xf32>
    %c0_11 = arith.constant 0 : index
    %c0_12 = arith.constant 0 : index
    %11 = vector.load %arg5[%c0_11, %c0_12] : memref<8x128xf32, #tpu.memory_space<vmem>>, vector<8x128xf32>
    tpu.vector_store %arg5[%c0_11, %c0_12], %10 {strides = array<i32>} : memref<8x128xf32, #tpu.memory_space<vmem>>, vector<8x128xf32>,
    return
  }
  func.func @transform_0(%arg0: i32) -> (i32, i32) {
    %c0_i32 = arith.constant 0 : i32
    %c0_i32_0 = arith.constant 0 : i32
    return %arg0, %c0_i32 : i32, i32
  }
  func.func @transform_1(%arg0: i32) -> (i32, i32) {
    %c0_i32 = arith.constant 0 : i32
    %c0_i32_0 = arith.constant 0 : i32
    %c0_i32_1 = arith.constant 0 : i32
    return %c0_i32, %c0_i32_0 : i32, i32
  }
  func.func @transform_2(%arg0: i32) -> (i32, i32) {
    %c0_i32 = arith.constant 0 : i32
    %c0_i32_0 = arith.constant 0 : i32
    %c0_i32_1 = arith.constant 0 : i32
    return %c0_i32, %c0_i32_0 : i32, i32
  }
  func.func @transform_3(%arg0: i32) -> (i32, i32) {
    %c0_i32 = arith.constant 0 : i32
    %c0_i32_0 = arith.constant 0 : i32
    %c0_i32_1 = arith.constant 0 : i32
    return %c0_i32, %c0_i32_0 : i32, i32
  }
  func.func @transform_4(%arg0: i32) -> (i32, i32) {
    %c0_i32 = arith.constant 0 : i32
    %c0_i32_0 = arith.constant 0 : i32
    return %arg0, %c0_i32 : i32, i32
  }
}

</mosaic_0001>

<bundles_post_ra>
// kernel: mlp_forward.1
= control target key start
LH: loop header
LB: loop body
LE: loop exit
PB: predicated region body
PF: predicated region fallthrough
CT: control target
= control target key end

     0   :  { %9 = vsyncpa [#allocation3], 0  ;;  %s680_s0 = inlined_call_operand.hbm [shape: f32[8,32], index: 0, kind: input, shape index: {}]   ;;  %s681_s1 = inlined_call_operand.hbm [shape: f32[32,128], index: 1, kind: input, shape index: {}]   ;;  %s682_s2 = inlined_call_operand.hbm [shape: f32[128,128], index: 2, kind: input, shape index: {}]   ;;  %s683_s3 = inlined_call_operand.hbm [shape: f32[128,128], index: 3, kind: input, shape index: {}]   ;;  %s684_s4 = inlined_call_operand.hbm [shape: f32[8,128], index: 4, kind: output, shape index: {}]  }
   0x1   :  { %10 = vsyncpa [#allocation6], 0 }
   0x2   :  { %11 = vsyncpa [#allocation9], 0 }
   0x3   :  { %12 = vsyncpa [#allocation4], 0  ;;  %s580_s15 = smov [#allocation5]  }
   0x4   :  { %s28_s16 = sshll.u32 %s580_s15, 4  ;;  %s29_s16 = int_to_ptr.vmem [resolvable:$true] %s28_s16 }
   0x5   :  { %s480_s17 = scalar_lea.vmem %s29_s16, 512  ;;  %p485_p1 = scmp.lt.s32.totalorder %s29_s16, %s29_s16 }
   0x6   :  { %p481_p0 = scmp.ne.s32.totalorder %s29_s16, %s480_s17  ;;  %p486_p2 = scmp.lt.s32.totalorder %s480_s17, %s480_s17 }
   0x8   :  { %p487_p3 = por %p486_p2, %p485_p1 }
   0xa   :  { %p488_p4 = pnand %p487_p3, %p481_p0 }
   0xc   :  { %491 = shalt.err (!%p488_p4)
}
   0xd   :  { %s581_s18 = smov 128   ;;  %s582_s19 = smov 8  }
   0xe   :  { %34 = dma.hbm_to_vmem [thread:$0]  %s681_s1, 512, %s29_s16, [#allocation6], %s581_s18, %s581_s18, %s582_s19  }
   0xf   :  { %s583_s22 = smov [#allocation2]   ;;  %s584_s24 = smov [#allocation7]  }
  0x10   :  { %s19_s23 = sshll.u32 %s583_s22, 4  ;;  %s40_s25 = sshll.u32 %s584_s24, 4  ;;  %s20_s23 = int_to_ptr.vmem [resolvable:$true] %s19_s23  ;;  %s41_s25 = int_to_ptr.vmem [resolvable:$true] %s40_s25 }
  0x11   :  { %s500_s26 = scalar_lea.vmem %s20_s23, 128  ;;  %p505_p6 = scmp.lt.s32.totalorder %s20_s23, %s20_s23 }
  0x12   :  { %p501_p5 = scmp.ne.s32.totalorder %s20_s23, %s500_s26  ;;  %p506_p7 = scmp.lt.s32.totalorder %s500_s26, %s500_s26 }
  0x14   :  { %p507_p8 = por %p506_p7, %p505_p6 }
  0x16   :  { %p508_p9 = pnand %p507_p8, %p501_p5 }
  0x18   :  { %511 = shalt.err (!%p508_p9)
}
  0x19   :  { %22 = dma.hbm_to_vmem [thread:$0]  %s680_s0, 128, %s20_s23, [#allocation3]  }
  0x1a   :  { %s520_s29 = scalar_lea.vmem %s41_s25, 2048  ;;  %p525_p11 = scmp.lt.s32.totalorder %s41_s25, %s41_s25 }
  0x1b   :  { %p521_p10 = scmp.ne.s32.totalorder %s41_s25, %s520_s29  ;;  %p526_p12 = scmp.lt.s32.totalorder %s520_s29, %s520_s29 }
  0x1d   :  { %p527_p13 = por %p526_p12, %p525_p11 }
  0x1f   :  { %p528_p0 = pnand %p527_p13, %p521_p10 }
  0x21   :  { %531 = shalt.err (!%p528_p0)
}
  0x22   :  { %46 = dma.hbm_to_vmem [thread:$0]  %s682_s2, 2048, %s41_s25, [#allocation6], %s581_s18, %s581_s18, %s582_s19  }
  0x23   :  { %s585_s5 = smov [#allocation8]  }
  0x24   :  { %s52_s6 = sshll.u32 %s585_s5, 4  ;;  %s53_s6 = int_to_ptr.vmem [resolvable:$true] %s52_s6 }
  0x25   :  { %s540_s7 = scalar_lea.vmem %s53_s6, 2048  ;;  %p545_p2 = scmp.lt.s32.totalorder %s53_s6, %s53_s6 }
  0x26   :  { %p541_p1 = scmp.ne.s32.totalorder %s53_s6, %s540_s7  ;;  %p546_p3 = scmp.lt.s32.totalorder %s540_s7, %s540_s7 }
  0x28   :  { %p547_p4 = por %p546_p3, %p545_p2 }
  0x2a   :  { %p548_p5 = pnand %p547_p4, %p541_p1 }
  0x2c   :  { %551 = shalt.err (!%p548_p5)
}
  0x2d   :  { %58 = dma.hbm_to_vmem [thread:$0]  %s683_s3, 2048, %s53_s6, [#allocation9], %s581_s18, %s581_s18, %s582_s19  }
  0x2e   :  { %572 = dma.done.wait [#allocation3], 128  }
  0x2f   :  { %573 = vsyncadd [#allocation3], 4294967168 }
  0x30   :  { %574 = dma.done.wait [#allocation6], 2560  }
  0x31   :  { %575 = vsyncadd [#allocation6], 4294964736 }
  0x32   :  { %576 = dma.done.wait [#allocation9], 2048  }
  0x33   :  { %577 = vsyncadd [#allocation9], 4294965248  ;;  %v586_v0 = vmov 0.0   ;;  %vm587_vm0 = vmmov 0   ;;  %v75_v1 = vld [vmem:[#allocation5 + $0x18] sm:$0xff]  ;;  %v74_v2 = vld [vmem:[#allocation5 + $0x10] sm:$0xff] }
  0x34   :  { %382 = vmatprep.subr.mxu0 %v586_v0  ;;  %390 = vmatprep.mubr.msk.f32.mxu0 %vm587_vm0, %v586_v0  ;;  %v166_v3 = vld [vmem:[#allocation7 + $0x78] sm:$0xff]  ;;  %v73_v4 = vld [vmem:[#allocation5 + $0x8] sm:$0xff]  ;;  %v165_v5 = vld [vmem:[#allocation7 + $0x70] sm:$0xff]  ;;  %vm76_vm1 = vcmask 261120   ;;  %s588_s2 = smov [#allocation10]  }
  0x35   :  { %393 = vmatprep.subr.mxu1 %v586_v0  ;;  %425 = vmatprep.mubr.msk.f32.mxu1 %vm587_vm0, %v586_v0  ;;  %v164_v6 = vld [vmem:[#allocation7 + $0x68] sm:$0xff]  ;;  %v72_v7 = vld [vmem:[#allocation5] sm:$0xff]  ;;  %v71_v8 = vld [vmem:[#allocation2] sm:$0xff]  ;;  %s331_s3 = sshll.u32 %s588_s2, 4  ;;  %s332_s3 = int_to_ptr.vmem [resolvable:$true] %s331_s3 }
  0x36   :  { %383 = vmatpush3.msra.mxu0 %v75_v1  ;;  %394 = vmatpush3.msra.mxu1 %v166_v3  ;;  %v163_v9 = vld [vmem:[#allocation7 + $0x60] sm:$0xff]  ;;  %v162_v10 = vld [vmem:[#allocation7 + $0x58] sm:$0xff]  ;;  %v161_v11 = vld [vmem:[#allocation7 + $0x50] sm:$0xff]  ;;  %s552_s9 = scalar_lea.vmem %s332_s3, 128  ;;  %p557_p7 = scmp.lt.s32.totalorder %s332_s3, %s332_s3 }
  0x37   :  { %384 = vmatprep.subr.mxu0 %v586_v0  ;;  %395 = vmatprep.subr.mxu1 %v586_v0  ;;  %v160_v12 = vld [vmem:[#allocation7 + $0x48] sm:$0xff]  ;;  %v159_v13 = vld [vmem:[#allocation7 + $0x40] sm:$0xff]  ;;  %v158_v14 = vld [vmem:[#allocation7 + $0x38] sm:$0xff]  ;;  %p553_p6 = scmp.ne.s32.totalorder %s332_s3, %s552_s9  ;;  %p558_p8 = scmp.lt.s32.totalorder %s552_s9, %s552_s9 }
  0x38   :  { %385 = vmatpush3.msra.mxu0 %v74_v2  ;;  %396 = vmatpush3.msra.mxu1 %v165_v5  ;;  %v157_v15 = vld [vmem:[#allocation7 + $0x30] sm:$0xff]  ;;  %v156_v16 = vld [vmem:[#allocation7 + $0x28] sm:$0xff]  ;;  %v155_v17 = vld [vmem:[#allocation7 + $0x20] sm:$0xff] }
  0x39   :  { %386 = vmatprep.subr.mxu0 %v586_v0  ;;  %397 = vmatprep.subr.mxu1 %v586_v0  ;;  %v154_v18 = vld [vmem:[#allocation7 + $0x18] sm:$0xff]  ;;  %v153_v19 = vld [vmem:[#allocation7 + $0x10] sm:$0xff]  ;;  %v152_v20 = vld [vmem:[#allocation7 + $0x8] sm:$0xff]  ;;  %p559_p9 = por %p558_p8, %p557_p7 }
  0x3a   :  { %387 = vmatpush3.msra.mxu0 %v73_v4  ;;  %398 = vmatpush3.msra.mxu1 %v164_v6  ;;  %v151_v21 = vld [vmem:[#allocation7] sm:$0xff]  ;;  %v253_v22 = vld [vmem:[#allocation8 + $0x78] sm:$0xff]  ;;  %v252_v23 = vld [vmem:[#allocation8 + $0x70] sm:$0xff] }
  0x3b   :  { %388 = vmatprep.subr.mxu0 %v586_v0  ;;  %399 = vmatprep.subr.mxu1 %v586_v0  ;;  %v251_v24 = vld [vmem:[#allocation8 + $0x68] sm:$0xff]  ;;  %v250_v25 = vld [vmem:[#allocation8 + $0x60] sm:$0xff]  ;;  %v249_v26 = vld [vmem:[#allocation8 + $0x58] sm:$0xff]  ;;  %p560_p10 = pnand %p559_p9, %p553_p6 }
  0x3c   :  { %389 = vmatpush3.msra.mxu0 %v72_v7  ;;  %400 = vmatpush3.msra.mxu1 %v163_v9  ;;  %v248_v27 = vld [vmem:[#allocation8 + $0x50] sm:$0xff]  ;;  %v247_v28 = vld [vmem:[#allocation8 + $0x48] sm:$0xff]  ;;  %v246_v29 = vld [vmem:[#allocation8 + $0x40] sm:$0xff] }
  0x3d   :  { %391 = vmatmul.mubr.msk.f32.vlgmr.msra.gmra.mxu0 %vm76_vm1, %v71_v8  ;;  %401 = vmatprep.subr.mxu1 %v586_v0  ;;  %v245_v30 = vld [vmem:[#allocation8 + $0x38] sm:$0xff]  ;;  %v244_v31 = vld [vmem:[#allocation8 + $0x30] sm:$0xff]  ;;  %v243_v32 = vld [vmem:[#allocation8 + $0x28] sm:$0xff] }
  0x3e   :  { %428 = vmatprep.subr.mxu0 %v586_v0  ;;  %402 = vmatpush3.msra.mxu1 %v162_v10  ;;  %v242_v33 = vld [vmem:[#allocation8 + $0x20] sm:$0xff]  ;;  %v241_v34 = vld [vmem:[#allocation8 + $0x18] sm:$0xff]  ;;  %v240_v35 = vld [vmem:[#allocation8 + $0x10] sm:$0xff] }
  0x3f   :  { %460 = vmatprep.mubr.msk.f32.mxu0 %vm587_vm0, %v586_v0  ;;  %403 = vmatprep.subr.mxu1 %v586_v0  ;;  %v239_v39 = vld [vmem:[#allocation8 + $0x8] sm:$0xff]  ;;  %v238_v40 = vld [vmem:[#allocation8] sm:$0xff] }
  0x40   :  { %404 = vmatpush3.msra.mxu1 %v161_v11  ;;  %429 = vmatpush3.msra.mxu0 %v253_v22 }
  0x41   :  { %405 = vmatprep.subr.mxu1 %v586_v0  ;;  %430 = vmatprep.subr.mxu0 %v586_v0 }
  0x42   :  { %406 = vmatpush3.msra.mxu1 %v160_v12  ;;  %431 = vmatpush3.msra.mxu0 %v252_v23 }
  0x43   :  { %407 = vmatprep.subr.mxu1 %v586_v0  ;;  %432 = vmatprep.subr.mxu0 %v586_v0 }
  0x44   :  { %408 = vmatpush3.msra.mxu1 %v159_v13  ;;  %433 = vmatpush3.msra.mxu0 %v251_v24 }
  0x45   :  { %409 = vmatprep.subr.mxu1 %v586_v0  ;;  %434 = vmatprep.subr.mxu0 %v586_v0 }
  0x46   :  { %410 = vmatpush3.msra.mxu1 %v158_v14  ;;  %435 = vmatpush3.msra.mxu0 %v250_v25 }
  0x47   :  { %411 = vmatprep.subr.mxu1 %v586_v0  ;;  %436 = vmatprep.subr.mxu0 %v586_v0 }
  0x48   :  { %412 = vmatpush3.msra.mxu1 %v157_v15  ;;  %437 = vmatpush3.msra.mxu0 %v249_v26 }
  0x49   :  { %413 = vmatprep.subr.mxu1 %v586_v0  ;;  %438 = vmatprep.subr.mxu0 %v586_v0 }
  0x4a   :  { %414 = vmatpush3.msra.mxu1 %v156_v16  ;;  %439 = vmatpush3.msra.mxu0 %v248_v27 }
  0x4b   :  { %415 = vmatprep.subr.mxu1 %v586_v0  ;;  %440 = vmatprep.subr.mxu0 %v586_v0 }
  0x4c   :  { %416 = vmatpush3.msra.mxu1 %v155_v17  ;;  %441 = vmatpush3.msra.mxu0 %v247_v28 }
  0x4d   :  { %417 = vmatprep.subr.mxu1 %v586_v0  ;;  %442 = vmatprep.subr.mxu0 %v586_v0 }
  0x4e   :  { %418 = vmatpush3.msra.mxu1 %v154_v18  ;;  %443 = vmatpush3.msra.mxu0 %v246_v29 }
  0x4f   :  { %419 = vmatprep.subr.mxu1 %v586_v0  ;;  %444 = vmatprep.subr.mxu0 %v586_v0 }
  0x50   :  { %420 = vmatpush3.msra.mxu1 %v153_v19  ;;  %445 = vmatpush3.msra.mxu0 %v245_v30 }
  0x51   :  { %421 = vmatprep.subr.mxu1 %v586_v0  ;;  %446 = vmatprep.subr.mxu0 %v586_v0 }
  0x52   :  { %422 = vmatpush3.msra.mxu1 %v152_v20  ;;  %447 = vmatpush3.msra.mxu0 %v244_v31 }
  0x53   :  { %423 = vmatprep.subr.mxu1 %v586_v0  ;;  %448 = vmatprep.subr.mxu0 %v586_v0 }
  0x54   :  { %424 = vmatpush3.msra.mxu1 %v151_v21  ;;  %449 = vmatpush3.msra.mxu0 %v243_v32 }
  0x55   :  { %450 = vmatprep.subr.mxu0 %v586_v0 }
  0x56   :  { %451 = vmatpush3.msra.mxu0 %v242_v33 }
  0x57   :  { %452 = vmatprep.subr.mxu0 %v586_v0 }
  0x58   :  { %453 = vmatpush3.msra.mxu0 %v241_v34 }
  0x59   :  { %454 = vmatprep.subr.mxu0 %v586_v0 }
  0x5a   :  { %455 = vmatpush3.msra.mxu0 %v240_v35 }
  0x5b   :  { %456 = vmatprep.subr.mxu0 %v586_v0 }
  0x5c   :  { %457 = vmatpush3.msra.mxu0 %v239_v39 }
  0x5d   :  { %458 = vmatprep.subr.mxu0 %v586_v0 }
  0x5e   :  { %459 = vmatpush3.msra.mxu0 %v238_v40 }
  0xfd   :  { %v146_v36 = vpop.f32.mrf.mxu0 }
  0xfe   :  { %v150_v37 = vmax.f32 %v146_v36, 0.0 }
  0xff   :  { %v392_v38 = vpop.f32.mrf.mxu0 }
 0x100   :  { %426 = vmatmul.mubr.f32.vlgmr.msra.gmra.mxu1 %v150_v37 }
 0x1c0   :  { %v233_v41 = vpop.f32.mrf.mxu1 }
 0x1c1   :  { %v237_v42 = vmax.f32 %v233_v41, 0.0 }
 0x1c2   :  { %v427_v43 = vpop.f32.mrf.mxu1 }
 0x1c3   :  { %461 = vmatmul.mubr.f32.vlgmr.msra.gmra.mxu0 %v237_v42 }
 0x283   :  { %v320_v44 = vpop.f32.mrf.mxu0 }
 0x284   :  { %324 = vst [vmem:[#allocation10] sm:$0xff] %v320_v44 }
 0x285   :  { %v462_v45 = vpop.f32.mrf.mxu0 }
 0x286   :  { %563 = shalt.err (!%p560_p10)
}
 0x287   :  { %334 = dma.vmem_to_hbm [thread:$0]  %s332_s3, 128, %s684_s4, [#allocation4]  }
 0x288   :  { %578 = dma.done.wait [#allocation4], 128  }
 0x289   :  { %579 = vsyncadd [#allocation4], 4294967168 }
 0x28a   :  { %338 = vsyncpa [#allocation3], 1 }
 0x28b   :  { %339 = vsyncpa [#allocation6], 1 }
 0x28c   :  { %340 = vsyncpa [#allocation9], 1 }
 0x28d   :  { %341 = vsyncpa [#allocation4], 1 }

</bundles_post_ra>
